<compile_context>
chip_gen: v7x
topology: tpu7x:2x2x1
jax: 0.10.0
libtpu: 0.0.40
codegen_flags: <defaults>
</compile_context>

<pallas_src>
from functools import lru_cache

import jax
import jax.numpy as jnp
from jax.experimental import pallas as pl
from jax.experimental.pallas import tpu as pltpu

_PI = float(jnp.pi)


# ---------------------------------------------------------------------------
# elementwise epilogue: single-divide atan2 matching HilbertTransformer._calc_Arg
# ---------------------------------------------------------------------------
def _calc_arg(x, y):
    """Arg(x + i*y) in (-pi, pi], with the same edge-case semantics as the
    torch module (_calc_Arg): x==0,y==0 -> 0; x<0,y==0 -> +pi; x==0 -> +/-pi/2.
    One divide + a degree-11 odd minimax polynomial (|err| < ~3e-6 rad)."""
    ax = jnp.abs(x)
    ay = jnp.abs(y)
    num = jnp.minimum(ax, ay)
    den = jnp.maximum(ax, ay)
    t = num / jnp.where(den == 0.0, 1.0, den)            # t in [0, 1]
    z = t * t
    p = (((((-1.1721200e-2 * z + 5.2653320e-2) * z - 1.1643287e-1) * z
           + 1.9354346e-1) * z - 3.3262347e-1) * z + 9.9997726e-1) * t
    r = jnp.where(ay > ax, _PI / 2.0 - p, p)              # |t|>1 reflection
    r = jnp.where(x < 0.0, _PI - r, r)                    # left half-plane
    return jnp.where(y < 0.0, -r, r)                      # lower half-plane


# ---------------------------------------------------------------------------
# kernel factory
# ---------------------------------------------------------------------------
def _make_kernel(even, inv_T, col_tiled):
    """Kernel computing the analytic signal's (phase, amplitude) for one tile.

    yi = x @ Mi on the MXU (Mi = imaginary circulant Hilbert operator);
    yr = x           (odd T)
       = x - (1/T) * (x.v) * v   with v[n] = (-1)^n  (even T, Nyquist term),
    computed on the VPU/XLU -- no second matmul, no real-part operator.
    """

    def body(x_full, x_cols, mi_ref, pha_ref, amp_ref):
        xm = x_full.astype(mi_ref.dtype)                  # bf16 cast (optional)
        yi = jnp.dot(xm, mi_ref[...], preferred_element_type=jnp.float32)
        if even:
            lane = jax.lax.broadcasted_iota(jnp.int32, (1, x_full.shape[-1]), 1)
            v_full = jnp.where((lane % 2) == 0, 1.0, -1.0).astype(jnp.float32)
            s = jnp.sum(x_full * v_full, axis=-1, keepdims=True)   # [TM, 1]
            if col_tiled:
                # column tile size is a multiple of 128 (even), so the parity
                # of the global column index equals the local parity.
                lane_c = jax.lax.broadcasted_iota(
                    jnp.int32, (1, x_cols.shape[-1]), 1)
                v_cols = jnp.where((lane_c % 2) == 0, 1.0, -1.0).astype(
                    jnp.float32)
            else:
                v_cols = v_full
            yr = x_cols - (inv_T * s) * v_cols
        else:
            yr = x_cols                                    # real part == identity
        amp_ref[...] = jnp.sqrt(yr * yr + yi * yi)
        pha_ref[...] = _calc_arg(yr, yi)

    if col_tiled:
        def kernel(x_ref, xc_ref, mi_ref, pha_ref, amp_ref):
            body(x_ref[...], xc_ref[...], mi_ref, pha_ref, amp_ref)
    else:
        def kernel(x_ref, mi_ref, pha_ref, amp_ref):
            x = x_ref[...]
            body(x, x, mi_ref, pha_ref, amp_ref)
    return kernel


# ---------------------------------------------------------------------------
# host-side constant construction, hardware-aware planning, wrapper
# ---------------------------------------------------------------------------
def _round_up(a, b):
    return ((a + b - 1) // b) * b


def _vmem_capacity_bytes():
    try:
        return int(pltpu.get_tpu_info().vmem_capacity_bytes)
    except Exception:
        return 64 << 20          # conservative fallback (v7x per-TC VMEM)


def _multi_tensorcore():
    """Best-effort detection of multi-TensorCore parts (v4 / v5p / v7x)."""
    try:
        kind = jax.devices()[0].device_kind.lower()
    except Exception:
        return False
    return any(tag in kind for tag in ("v7", "7x", "v4", "v5p"))


@lru_cache(maxsize=16)
def _build_hilbert_imag_operator(T, T_pad, op_dtype_name):
    """Imaginary part of the fused FFT -> 2*heaviside(f,0.5) -> iFFT operator
    as a [T_pad, T_pad] circulant matrix (zero-padded beyond T), cached per
    (T, T_pad, dtype).  Built from one length-T ifft + a circulant gather
    (O(T log T + T^2)) -- the real part is never materialized (identity /
    rank-1 Nyquist correction applied in-kernel)."""
    op_dtype = jnp.bfloat16 if op_dtype_name == "bf16" else jnp.float32
    f = jnp.concatenate([
        jnp.arange(0, (T - 1) // 2 + 1, dtype=jnp.float32),
        jnp.arange(-(T // 2), 0, dtype=jnp.float32),
    ]) / float(T)
    u = jnp.where(f > 0, 1.0, jnp.where(f == 0, 0.5, 0.0)).astype(jnp.float32)
    h = (2.0 * u).astype(jnp.complex64)
    a_im = jnp.imag(jnp.fft.ifft(h)).astype(jnp.float32)      # circulant kernel
    n = jnp.arange(T, dtype=jnp.int32)
    idx = (n[None, :] - n[:, None]) % T                       # (col - row) mod T
    mi = a_im[idx]                                            # Mi[m, t] = Im(a[t-m])
    if T_pad != T:
        mi = jnp.pad(mi, ((0, T_pad - T), (0, T_pad - T)))
    return mi.astype(op_dtype)


def _plan(M, T, requested_tm, op_bytes, capacity, multi_tc, force_col_tile):
    """Pick (T_pad, TN, n_col_blocks, TM, M_pad, vmem_limit)."""
    budget = int(capacity * 0.80)                 # generation-aware VMEM budget
    # ---- operator column tiling (keeps double-buffered operator resident) ----
    if force_col_tile is not None:
        TN = max(128, _round_up(int(force_col_tile), 128))
        T_pad = _round_up(T, TN)
    elif 2 * T * T * op_bytes <= budget // 2:
        TN, T_pad = T, T                          # whole operator stays resident
    else:
        TN = 512
        while TN > 128 and 2 * _round_up(T, TN) * TN * op_bytes > budget // 2:
            TN //= 2
        T_pad = _round_up(T, TN)
    NC = T_pad // TN
    op_resident = 2 * T_pad * TN * op_bytes       # double-buffered operator blocks

    # ---- row tile ----
    if NC > 1:
        requested_tm = max(requested_tm, 512)     # amortize streamed-operator DMA
        per_row = (2 * T_pad + 2 * TN + 4 * TN) * 4   # x, x_cols, pha, amp (x2 bufs)
    else:
        per_row = (2 * T_pad + 4 * T_pad) * 4         # x, pha, amp (x2 bufs)
    avail = budget - op_resident - (2 << 20)
    tm_cap = max(8, (avail // per_row) // 8 * 8) if avail > 8 * per_row else 8
    tm = min(_round_up(max(requested_tm, 8), 8), _round_up(M, 8), tm_cap)
    if multi_tc and NC == 1 and M >= 16 and _round_up(M, tm) // tm < 2:
        tm = _round_up((M + 1) // 2, 8)           # >= 2 grid steps for 2 TCs
    M_pad = _round_up(M, tm)

    needed = op_resident + tm * per_row + (4 << 20)
    vmem_limit = None
    if needed > (12 << 20):                       # above smallest default scoped limit
        vmem_limit = int(min(int(capacity * 0.92), max(needed, 32 << 20)))
    return T_pad, TN, NC, tm, M_pad, vmem_limit


def hilbert_transformer(sig, *, row_tile=256, use_bf16_operators=True,
                        force_col_tile=None, stack_output=True):
    """Pallas equivalent of HilbertTransformer.forward (axis=2, n=None).

    sig: float32 [B, C, T] -> out float32 [B, C, T, 2] (phase, amplitude).
    stack_output=False returns the two lane-dense [B, C, T] slabs (pha, amp)
    and skips the lane-sparse last-axis stack.
    """
    sig = jnp.asarray(sig, jnp.float32)
    B, C, T = sig.shape
    M = B * C
    even = (T % 2) == 0

    op_bytes = 2 if use_bf16_operators else 4
    T_pad, TN, NC, TM, M_pad, vmem_limit = _plan(
        M, T, row_tile, op_bytes, _vmem_capacity_bytes(), _multi_tensorcore(),
        force_col_tile)

    mi = _build_hilbert_imag_operator(
        T, T_pad, "bf16" if use_bf16_operators else "f32")

    x2 = sig.reshape(M, T)
    if M_pad != M or T_pad != T:
        x2 = jnp.pad(x2, ((0, M_pad - M), (0, T_pad - T)))

    kernel = _make_kernel(even=even, inv_T=1.0 / float(T), col_tiled=(NC > 1))

    in_specs = [pl.BlockSpec((TM, T_pad), lambda i, j: (i, 0))]   # full signal rows
    inputs = [x2]
    if NC > 1:
        # identity-path column slab of the same signal (avoids dynamic lane slicing)
        in_specs.append(pl.BlockSpec((TM, TN), lambda i, j: (i, j)))
        inputs.append(x2)
    in_specs.append(pl.BlockSpec((T_pad, TN), lambda i, j: (0, j)))  # Im-operator cols
    inputs.append(mi)

    pha, amp = pl.pallas_call(
        kernel,
        out_shape=(jax.ShapeDtypeStruct((M_pad, T_pad), jnp.float32),
                   jax.ShapeDtypeStruct((M_pad, T_pad), jnp.float32)),
        grid_spec=pltpu.PrefetchScalarGridSpec(
            num_scalar_prefetch=0,
            grid=(M_pad // TM, NC),
            in_specs=in_specs,
            out_specs=[pl.BlockSpec((TM, TN), lambda i, j: (i, j)),
                       pl.BlockSpec((TM, TN), lambda i, j: (i, j))],
        ),
        compiler_params=pltpu.CompilerParams(
            dimension_semantics=("parallel", "parallel"),
            vmem_limit_bytes=vmem_limit),
    )(*inputs)

    pha = pha[:M, :T].reshape(B, C, T)
    amp = amp[:M, :T].reshape(B, C, T)
    if not stack_output:
        return pha, amp
    # Module contract: [B, C, T, 2] with (...,0)=phase, (...,1)=amplitude.
    return jnp.stack([pha, amp], axis=-1)


# ---------------------------------------------------------------------------
# plain-JAX reference (test only)
# ---------------------------------------------------------------------------
def _reference_analytic(sig):
    """Plain-JAX reference of BaseHilbertTransformer.transform (axis=-1)."""
    sig = jnp.asarray(sig, jnp.float32)
    T = sig.shape[-1]
    f = jnp.concatenate([
        jnp.arange(0, (T - 1) // 2 + 1, dtype=jnp.float32),
        jnp.arange(-(T // 2), 0, dtype=jnp.float32),
    ]) / float(T)
    u = jnp.where(f > 0, 1.0, jnp.where(f == 0, 0.5, 0.0)).astype(jnp.float32)
    xf = jnp.fft.fft(sig, axis=-1)
    return jnp.fft.ifft(xf * (2.0 * u), axis=-1)


def _check(sig, out, *, atol, rtol):
    pha, amp = out[..., 0], out[..., 1]
    ref = _reference_analytic(sig)
    assert jnp.allclose(amp, jnp.abs(ref), atol=atol, rtol=rtol)
    assert jnp.allclose(amp * jnp.cos(pha), ref.real, atol=atol, rtol=rtol)
    assert jnp.allclose(amp * jnp.sin(pha), ref.imag, atol=atol, rtol=rtol)


if __name__ == "__main__":
    key = jax.random.PRNGKey(0)

    # module-contract shapes: sig [Batch, chns, time] -> out [Batch, chns, time, 2]
    B, C, T = 2, 4, 16
    sig = jax.random.normal(key, (B, C, T), dtype=jnp.float32)

    # 1) default path (bf16 operator on the MXU, f32 accumulation)
    out = jax.block_until_ready(hilbert_transformer(sig))
    assert out.shape == (B, C, T, 2) and out.dtype == jnp.float32
    _check(sig, out, atol=3e-2, rtol=3e-2)

    # 2) f32 operator path, tight tolerance (even T -> rank-1 Nyquist correction)
    out32 = jax.block_until_ready(hilbert_transformer(sig, use_bf16_operators=False))
    _check(sig, out32, atol=2e-3, rtol=2e-3)

    # 3) odd T (real part of the analytic operator is exactly the identity)
    sig_odd = jax.random.normal(jax.random.PRNGKey(1), (1, 2, 15), dtype=jnp.float32)
    out_odd = jax.block_until_ready(
        hilbert_transformer(sig_odd, use_bf16_operators=False))
    _check(sig_odd, out_odd, atol=2e-3, rtol=2e-3)

    # 4) forced operator-column streaming (exercises the large-T / v7x path)
    sig_ct = jax.random.normal(jax.random.PRNGKey(2), (1, 2, 300), dtype=jnp.float32)
    out_ct = jax.block_until_ready(
        hilbert_transformer(sig_ct, use_bf16_operators=False, force_col_tile=128))
    _check(sig_ct, out_ct, atol=5e-3, rtol=5e-3)

    print("KERNEL_OK")
</pallas_src>

<mosaic_0001>
module attributes {stable_mosaic.version = 11 : i64} {
  func.func @kernel(%arg0: i32, %arg1: i32, %arg2: memref<8x16xf32, #tpu.memory_space<vmem>>, %arg3: memref<16x16xbf16, #tpu.memory_space<vmem>>, %arg4: memref<8x16xf32, #tpu.memory_space<vmem>>, %arg5: memref<8x16xf32, #tpu.memory_space<vmem>>) attributes {dimension_semantics = [#tpu.dimension_semantics<parallel>, #tpu.dimension_semantics<parallel>], iteration_bounds = array<i64: 1, 1>, scalar_prefetch = 0 : i64, scratch_operands = 0 : i64, tpu.core_type = #tpu.core_type<tc>, window_params = [{transform_indices = @transform_0, window_bounds = array<i64: 8, 16>}, {transform_indices = @transform_1, window_bounds = array<i64: 16, 16>}, {transform_indices = @transform_2, window_bounds = array<i64: 8, 16>}, {transform_indices = @transform_3, window_bounds = array<i64: 8, 16>}]} {
    %c0 = arith.constant 0 : index
    %c0_0 = arith.constant 0 : index
    %0 = vector.load %arg2[%c0, %c0_0] : memref<8x16xf32, #tpu.memory_space<vmem>>, vector<8x16xf32>
    %1 = arith.truncf %0 : vector<8x16xf32> to vector<8x16xbf16>
    %c0_1 = arith.constant 0 : index
    %c0_2 = arith.constant 0 : index
    %2 = vector.load %arg3[%c0_1, %c0_2] : memref<16x16xbf16, #tpu.memory_space<vmem>>, vector<16x16xbf16>
    %cst = arith.constant dense<0.000000e+00> : vector<8x16xf32>
    %3 = tpu.matmul %1, %2, %cst {dimension_numbers = #tpu.dot_dimension_numbers<[1], [0], [0], [1], [0, 0, 1, 1], [], []>} : vector<8x16xbf16>, vector<16x16xbf16>, vector<8x16xf32> -> vector<8x16xf32>
    %4 = tpu.iota {dimensions = array<i32: 1>} : vector<1x16xi32>
    %c2_i32 = arith.constant 2 : i32
    %c0_i32 = arith.constant 0 : i32
    %5 = arith.cmpi eq, %c2_i32, %c0_i32 : i32
    %c1_i32 = arith.constant 1 : i32
    %6 = arith.select %5, %c1_i32, %c2_i32 : i32
    %7 = vector.broadcast %6 : i32 to vector<1x16xi32>
    %8 = arith.remsi %4, %7 : vector<1x16xi32>
    %c0_i32_3 = arith.constant 0 : i32
    %9 = vector.broadcast %c0_i32_3 : i32 to vector<1x16xi32>
    %10 = arith.cmpi ne, %8, %9 : vector<1x16xi32>
    %c0_i32_4 = arith.constant 0 : i32
    %11 = vector.broadcast %c0_i32_4 : i32 to vector<1x16xi32>
    %12 = arith.cmpi slt, %8, %11 : vector<1x16xi32>
    %c0_i32_5 = arith.constant 0 : i32
    %13 = arith.cmpi slt, %6, %c0_i32_5 : i32
    %14 = vector.broadcast %13 : i1 to vector<1x16xi1>
    %15 = vector.broadcast %14 : vector<1x16xi1> to vector<1x16xi1>
    %16 = arith.xori %12, %15 : vector<1x16xi1>
    %17 = arith.andi %16, %10 : vector<1x16xi1>
    %18 = vector.broadcast %6 : i32 to vector<1x16xi32>
    %19 = arith.addi %8, %18 : vector<1x16xi32>
    %20 = arith.select %17, %19, %8 : vector<1x16xi1>, vector<1x16xi32>
    %c0_i32_6 = arith.constant 0 : i32
    %21 = vector.broadcast %c0_i32_6 : i32 to vector<1x16xi32>
    %22 = arith.cmpi eq, %20, %21 : vector<1x16xi32>
    %cst_7 = arith.constant 1.000000e+00 : f32
    %cst_8 = arith.constant -1.000000e+00 : f32
    %23 = vector.broadcast %cst_7 : f32 to vector<1x16xf32>
    %24 = vector.broadcast %cst_8 : f32 to vector<1x16xf32>
    %25 = arith.select %22, %23, %24 : vector<1x16xi1>, vector<1x16xf32>
    %26 = vector.broadcast %25 : vector<1x16xf32> to vector<8x16xf32>
    %27 = arith.mulf %0, %26 : vector<8x16xf32>
    %cst_9 = arith.constant dense<0.000000e+00> : vector<8xf32>
    %28 = vector.multi_reduction <add>, %27, %cst_9 [1] : vector<8x16xf32> to vector<8xf32>
    %29 = vector.shape_cast %28 : vector<8xf32> to vector<8x1xf32>
    %cst_10 = arith.constant 6.250000e-02 : f32
    %30 = vector.broadcast %cst_10 : f32 to vector<8x1xf32>
    %31 = arith.mulf %30, %29 : vector<8x1xf32>
    %32 = vector.broadcast %31 : vector<8x1xf32> to vector<8x16xf32>
    %33 = vector.broadcast %25 : vector<1x16xf32> to vector<8x16xf32>
    %34 = arith.mulf %32, %33 : vector<8x16xf32>
    %35 = arith.subf %0, %34 : vector<8x16xf32>
    %36 = arith.mulf %35, %35 : vector<8x16xf32>
    %37 = arith.mulf %3, %3 : vector<8x16xf32>
    %38 = arith.addf %36, %37 : vector<8x16xf32>
    %39 = math.sqrt %38 : vector<8x16xf32>
    %c0_11 = arith.constant 0 : index
    %c0_12 = arith.constant 0 : index
    %40 = vector.load %arg5[%c0_11, %c0_12] : memref<8x16xf32, #tpu.memory_space<vmem>>, vector<8x16xf32>
    tpu.vector_store %arg5[%c0_11, %c0_12], %39 {strides = array<i32>} : memref<8x16xf32, #tpu.memory_space<vmem>>, vector<8x16xf32>,
    %41 = math.absf %35 : vector<8x16xf32>
    %42 = math.absf %3 : vector<8x16xf32>
    %43 = arith.minimumf %41, %42 : vector<8x16xf32>
    %44 = arith.maximumf %41, %42 : vector<8x16xf32>
    %cst_13 = arith.constant 0.000000e+00 : f32
    %45 = vector.broadcast %cst_13 : f32 to vector<8x16xf32>
    %46 = arith.cmpf oeq, %44, %45 : vector<8x16xf32>
    %cst_14 = arith.constant 1.000000e+00 : f32
    %47 = vector.broadcast %cst_14 : f32 to vector<8x16xf32>
    %48 = arith.select %46, %47, %44 : vector<8x16xi1>, vector<8x16xf32>
    %49 = arith.divf %43, %48 : vector<8x16xf32>
    %50 = arith.mulf %49, %49 : vector<8x16xf32>
    %cst_15 = arith.constant -1.172120e-02 : f32
    %51 = vector.broadcast %cst_15 : f32 to vector<8x16xf32>
    %52 = arith.mulf %51, %50 : vector<8x16xf32>
    %cst_16 = arith.constant 0.0526533201 : f32
    %53 = vector.broadcast %cst_16 : f32 to vector<8x16xf32>
    %54 = arith.addf %52, %53 : vector<8x16xf32>
    %55 = arith.mulf %54, %50 : vector<8x16xf32>
    %cst_17 = arith.constant 0.116432868 : f32
    %56 = vector.broadcast %cst_17 : f32 to vector<8x16xf32>
    %57 = arith.subf %55, %56 : vector<8x16xf32>
    %58 = arith.mulf %57, %50 : vector<8x16xf32>
    %cst_18 = arith.constant 0.193543464 : f32
    %59 = vector.broadcast %cst_18 : f32 to vector<8x16xf32>
    %60 = arith.addf %58, %59 : vector<8x16xf32>
    %61 = arith.mulf %60, %50 : vector<8x16xf32>
    %cst_19 = arith.constant 0.332623482 : f32
    %62 = vector.broadcast %cst_19 : f32 to vector<8x16xf32>
    %63 = arith.subf %61, %62 : vector<8x16xf32>
    %64 = arith.mulf %63, %50 : vector<8x16xf32>
    %cst_20 = arith.constant 0.999977231 : f32
    %65 = vector.broadcast %cst_20 : f32 to vector<8x16xf32>
    %66 = arith.addf %64, %65 : vector<8x16xf32>
    %67 = arith.mulf %66, %49 : vector<8x16xf32>
    %68 = arith.cmpf ogt, %42, %41 : vector<8x16xf32>
    %cst_21 = arith.constant 1.57079637 : f32
    %69 = vector.broadcast %cst_21 : f32 to vector<8x16xf32>
    %70 = arith.subf %69, %67 : vector<8x16xf32>
    %71 = arith.select %68, %70, %67 : vector<8x16xi1>, vector<8x16xf32>
    %cst_22 = arith.constant 0.000000e+00 : f32
    %72 = vector.broadcast %cst_22 : f32 to vector<8x16xf32>
    %73 = arith.cmpf olt, %35, %72 : vector<8x16xf32>
    %cst_23 = arith.constant 3.14159274 : f32
    %74 = vector.broadcast %cst_23 : f32 to vector<8x16xf32>
    %75 = arith.subf %74, %71 : vector<8x16xf32>
    %76 = arith.select %73, %75, %71 : vector<8x16xi1>, vector<8x16xf32>
    %cst_24 = arith.constant 0.000000e+00 : f32
    %77 = vector.broadcast %cst_24 : f32 to vector<8x16xf32>
    %78 = arith.cmpf olt, %3, %77 : vector<8x16xf32>
    %cst_25 = arith.constant 0.000000e+00 : f32
    %79 = vector.broadcast %cst_25 : f32 to vector<8x16xf32>
    %80 = arith.subf %79, %76 : vector<8x16xf32>
    %81 = arith.select %78, %80, %76 : vector<8x16xi1>, vector<8x16xf32>
    %c0_26 = arith.constant 0 : index
    %c0_27 = arith.constant 0 : index
    %82 = vector.load %arg4[%c0_26, %c0_27] : memref<8x16xf32, #tpu.memory_space<vmem>>, vector<8x16xf32>
    tpu.vector_store %arg4[%c0_26, %c0_27], %81 {strides = array<i32>} : memref<8x16xf32, #tpu.memory_space<vmem>>, vector<8x16xf32>,
    return
  }
  func.func @transform_0(%arg0: i32, %arg1: i32) -> (i32, i32) {
    %c0_i32 = arith.constant 0 : i32
    %c0_i32_0 = arith.constant 0 : i32
    return %arg0, %c0_i32 : i32, i32
  }
  func.func @transform_1(%arg0: i32, %arg1: i32) -> (i32, i32) {
    %c0_i32 = arith.constant 0 : i32
    %c0_i32_0 = arith.constant 0 : i32
    return %c0_i32, %arg1 : i32, i32
  }
  func.func @transform_2(%arg0: i32, %arg1: i32) -> (i32, i32) {
    %c0_i32 = arith.constant 0 : i32
    return %arg0, %arg1 : i32, i32
  }
  func.func @transform_3(%arg0: i32, %arg1: i32) -> (i32, i32) {
    %c0_i32 = arith.constant 0 : i32
    return %arg0, %arg1 : i32, i32
  }
}

</mosaic_0001>

<bundles_post_ra>
// kernel: tpu_custom_call.1
= control target key start
LH: loop header
LB: loop body
LE: loop exit
PB: predicated region body
PF: predicated region fallthrough
CT: control target
= control target key end

     0   :  { %9 = vsyncpa [#allocation3], 0  ;;  %s412_s0 = inlined_call_operand.hbm [shape: f32[8,16], index: 0, kind: input, shape index: {}]   ;;  %s413_s1 = inlined_call_operand.hbm [shape: bf16[16,16], index: 1, kind: input, shape index: {}]   ;;  %s414_s2 = inlined_call_operand.hbm [shape: f32[8,16], index: 2, kind: output, shape index: {0}]   ;;  %s415_s3 = inlined_call_operand.hbm [shape: f32[8,16], index: 3, kind: output, shape index: {1}]  }
   0x1   :  { %10 = vsyncpa [#allocation6], 0 }
   0x2   :  { %11 = vsyncpa [#allocation4], 0 }
   0x3   :  { %12 = vsyncpa [#allocation9], 0  ;;  %s312_s12 = smov [#allocation2]   ;;  %s313_s14 = smov [#allocation5]  }
   0x4   :  { %s19_s13 = sshll.u32 %s312_s12, 4  ;;  %s28_s15 = sshll.u32 %s313_s14, 4  ;;  %s20_s13 = int_to_ptr.vmem [resolvable:$true] %s19_s13  ;;  %s341_s15 = int_to_ptr.vmem [resolvable:$true] %s28_s15 }
   0x5   :  { %s216_s18 = scalar_lea.hbm %s412_s0, 128 }
   0x6   :  { %p217_p0 = scmp.ne.s32.totalorder %s412_s0, %s216_s18  ;;  %p220_p1 = scmp.lt.u32.totalorder %s216_s18, %s412_s0 }
   0x8   :  { %p222_p2 = pnand %p220_p1, %p217_p0 }
   0xa   :  { %225 = shalt.err (!%p222_p2)
}
   0xb   :  { %s226_s23 = scalar_lea.vmem %s20_s13, 128  ;;  %p231_p4 = scmp.lt.s32.totalorder %s20_s13, %s20_s13 }
   0xc   :  { %p227_p3 = scmp.ne.s32.totalorder %s20_s13, %s226_s23  ;;  %p232_p5 = scmp.lt.s32.totalorder %s226_s23, %s226_s23 }
   0xe   :  { %p233_p6 = por %p232_p5, %p231_p4 }
  0x10   :  { %p234_p7 = pnand %p233_p6, %p227_p3 }
  0x12   :  { %237 = shalt.err (!%p234_p7)
}
  0x13   :  { %22 = dma.hbm_to_vmem [thread:$0]  %s412_s0, 128, %s20_s13, [#allocation3]  }
  0x14   :  { %s238_s28 = scalar_lea.hbm %s413_s1, 128 }
  0x15   :  { %p239_p8 = scmp.ne.s32.totalorder %s413_s1, %s238_s28  ;;  %p242_p9 = scmp.lt.u32.totalorder %s238_s28, %s413_s1 }
  0x17   :  { %p244_p10 = pnand %p242_p9, %p239_p8 }
  0x19   :  { %247 = shalt.err (!%p244_p10)
}
  0x1a   :  { %s248_s6 = scalar_lea.vmem %s341_s15, 128  ;;  %p253_p12 = scmp.lt.s32.totalorder %s341_s15, %s341_s15 }
  0x1b   :  { %p249_p11 = scmp.ne.s32.totalorder %s341_s15, %s248_s6  ;;  %p254_p13 = scmp.lt.s32.totalorder %s248_s6, %s248_s6 }
  0x1d   :  { %p255_p0 = por %p254_p13, %p253_p12 }
  0x1f   :  { %p256_p1 = pnand %p255_p0, %p249_p11 }
  0x21   :  { %259 = shalt.err (!%p256_p1)
}
  0x22   :  { %s314_s0 = smov 64   ;;  %s315_s7 = smov 4  }
  0x23   :  { %34 = dma.hbm_to_vmem [thread:$0]  %s413_s1, 128, %s341_s15, [#allocation6], %s314_s0, %s314_s0, %s315_s7  }
  0x24   :  { %304 = dma.done.wait [#allocation3], 128  }
  0x25   :  { %305 = vsyncadd [#allocation3], 4294967168 }
  0x26   :  { %306 = dma.done.wait [#allocation6], 128  }
  0x27   :  { %307 = vsyncadd [#allocation6], 4294967168  ;;  %v96_v0 = vlaneseq  ;;  %v316_v1 = vmov 0.0   ;;  %vm317_vm0 = vmmov 0   ;;  %v211_v4 = vld [vmem:[#allocation5] sm:$0xff]   ;;  %v318_v5 = vmov -1.0  }
  0x28   :  { %196 = vmatprep.subr.bf16.mxu0 %v316_v1  ;;  %198 = vmatprep.mubr.msk.bf16.mxu0 %vm317_vm0, %v316_v1  ;;  %v42_v7 = vld [vmem:[#allocation2] sm:$0xff]  ;;  %vm52_vm2 = vcmask 130048   ;;  %s319_s1 = smov [#allocation8]  }
  0x29   :  { %v97_v2 = vand.u32 127, %v96_v0  ;;  %197 = vmatpush3.bf16.msra.mxu0 %v211_v4  ;;  %v43_v8 = vpack.c.bf16 %v42_v7, %v42_v7  ;;  %s176_s10 = sshll.u32 %s319_s1, 4  ;;  %s177_s10 = int_to_ptr.vmem [resolvable:$true] %s176_s10 }
  0x2a   :  { %s260_s11 = scalar_lea.vmem %s177_s10, 128  ;;  %p265_p3 = scmp.lt.s32.totalorder %s177_s10, %s177_s10 }
  0x2b   :  { %v102_v3 = vand.u32 1, %v97_v2  ;;  %p261_p2 = scmp.ne.s32.totalorder %s177_s10, %s260_s11  ;;  %p266_p4 = scmp.lt.s32.totalorder %s260_s11, %s260_s11 }
  0x2c   :  { %199 = vmatmul.mubr.msk.bf16.vlgmr.msra.gmra.mrb[0].mxu0 %vm52_vm2, %v43_v8 }
  0x2d   :  { %vm110_vm1 = vcmp.eq.s32.totalorder %v102_v3, 0  ;;  %p267_p5 = por %p266_p4, %p265_p3 }
  0x2e   :  { %v111_v6 = vsel %vm110_vm1, 1.0, %v318_v5 }
  0x2f   :  { %v112_v9 = vmul.f32 %v111_v6, %v42_v7  ;;  %p268_p6 = pnand %p267_p5, %p261_p2 }
  0x31   :  { %v113_v10 = vsel %vm52_vm2, %v112_v9, 0.0 }
  0x32   :  { %114 = vadd.xlane.f32.xlu0 %v113_v10 }
  0xbf   :  { %v115_v11 = vpop.xlane.xlu0 %114 }
  0xc0   :  { %v116_v12 = vmul.f32 0.0625, %v115_v11 }
  0xc2   :  { %v117_v13 = vmul.f32 %v116_v12, %v111_v6 }
  0xc4   :  { %v374_v14 = vsub.f32 %v42_v7, %v117_v13 }
  0xc6   :  { %v130_v15 = vand.u32 2147483647, %v374_v14  ;;  %v119_v16 = vmul.f32 %v374_v14, %v374_v14 }
  0xff   :  { %v379_v17 = vpop.f32.mrb[0].mxu0 }
 0x100   :  { %v120_v18 = vmul.f32 %v379_v17, %v379_v17  ;;  %v131_v19 = vand.u32 2147483647, %v379_v17  ;;  %v200_v20 = vpop.f32.mrb[1].mxu0 }
 0x101   :  { %v93_v21 = vpop.f32.mrb[2].mxu0 }
 0x102   :  { %v121_v22 = vadd.f32 %v120_v18, %v119_v16  ;;  %v133_v23 = vmax.f32 %v130_v15, %v131_v19  ;;  %v201_v24 = vpop.f32.mrb[3].mxu0  ;;  %v132_v27 = vmin.f32 %v130_v15, %v131_v19 }
 0x104   :  { %vm134_vm3 = vcmp.eq.f32.partialorder %v133_v23, 0.0  ;;  %212 = vrsqrt.f32 %v121_v22  ;;  %vm124_vm4 = vcmp.eq.f32.partialorder %v121_v22, inf  ;;  %v127_v30 = vand.u32 2147483648, %v121_v22 }
 0x105   :  { %v135_v25 = vsel %vm134_vm3, 1.0, %v133_v23  ;;  %vm126_vm5 = vcmp.eq.f32.partialorder %v121_v22, 0.0 }
 0x106   :  { %214 = vrcp.f32 %v135_v25 }
 0x10e   :  { %v213_v26 = vpop.eup %212 }
 0x10f   :  { %v123_v28 = vmul.f32 %v213_v26, %v121_v22 }
 0x110   :  { %v215_v29 = vpop.eup %214 }
 0x111   :  { %v137_v31 = vmul.f32 %v215_v29, %v132_v27  ;;  %v125_v32 = vsel %vm124_vm4, %v121_v22, %v123_v28 }
 0x112   :  { %v128_v33 = vsel %vm126_vm5, %v127_v30, %v125_v32 }
 0x113   :  { %v138_v34 = vmul.f32 %v137_v31, %v137_v31  ;;  %129 = vst.msk [vmem:[#allocation8] sm:$0xff] %vm52_vm2, %v128_v33 }
 0x114   :  { %271 = shalt.err (!%p268_p6)
}
 0x115   :  { %s272_s14 = scalar_lea.hbm %s415_s3, 128 }
 0x116   :  { %p273_p7 = scmp.ne.s32.totalorder %s415_s3, %s272_s14  ;;  %p276_p8 = scmp.lt.u32.totalorder %s272_s14, %s415_s3 }
 0x118   :  { %p278_p9 = pnand %p276_p8, %p273_p7 }
 0x11a   :  { %281 = shalt.err (!%p278_p9)
}
 0x11b   :  { %179 = dma.vmem_to_hbm [thread:$0]  %s177_s10, 128, %s415_s3, [#allocation9]   ;;  %v139_v35 = vmul.f32 -0.0117212, %v138_v34  ;;  %vm150_vm6 = vcmp.gt.f32.partialorder %v131_v19, %v130_v15  ;;  %vm153_vm7 = vcmp.lt.f32.partialorder %v374_v14, 0.0  ;;  %vm156_vm8 = vcmp.lt.f32.partialorder %v379_v17, 0.0 }
 0x11c   :  { %s320_s21 = smov [#allocation7]  }
 0x11d   :  { %v140_v36 = vadd.f32 0.05265332, %v139_v35  ;;  %s166_s22 = sshll.u32 %s320_s21, 4  ;;  %s167_s22 = int_to_ptr.vmem [resolvable:$true] %s166_s22 }
 0x11e   :  { %s282_s3 = scalar_lea.vmem %s167_s22, 128  ;;  %p287_p11 = scmp.lt.s32.totalorder %s167_s22, %s167_s22 }
 0x11f   :  { %v141_v37 = vmul.f32 %v140_v36, %v138_v34  ;;  %p283_p10 = scmp.ne.s32.totalorder %s167_s22, %s282_s3  ;;  %p288_p12 = scmp.lt.s32.totalorder %s282_s3, %s282_s3 }
 0x121   :  { %v192_v38 = vadd.f32 -0.11643287, %v141_v37  ;;  %p289_p13 = por %p288_p12, %p287_p11 }
 0x123   :  { %v143_v39 = vmul.f32 %v192_v38, %v138_v34  ;;  %p290_p0 = pnand %p289_p13, %p283_p10 }
 0x125   :  { %v144_v40 = vadd.f32 0.19354346, %v143_v39 }
 0x127   :  { %v145_v41 = vmul.f32 %v144_v40, %v138_v34 }
 0x129   :  { %v193_v42 = vadd.f32 -0.33262348, %v145_v41 }
 0x12b   :  { %v147_v43 = vmul.f32 %v193_v42, %v138_v34 }
 0x12d   :  { %v148_v44 = vadd.f32 0.99997723, %v147_v43 }
 0x12f   :  { %v149_v45 = vmul.f32 %v148_v44, %v137_v31 }
 0x131   :  { %v151_v46 = vsub.f32 1.5707964, %v149_v45 }
 0x133   :  { %v152_v47 = vsel %vm150_vm6, %v151_v46, %v149_v45 }
 0x134   :  { %v154_v48 = vsub.f32 3.1415927, %v152_v47 }
 0x136   :  { %v155_v49 = vsel %vm153_vm7, %v154_v48, %v152_v47 }
 0x137   :  { %v157_v50 = vsub.f32 0.0, %v155_v49 }
 0x139   :  { %v158_v51 = vsel %vm156_vm8, %v157_v50, %v155_v49 }
 0x13a   :  { %159 = vst.msk [vmem:[#allocation7] sm:$0xff] %vm52_vm2, %v158_v51 }
 0x13b   :  { %293 = shalt.err (!%p290_p0)
}
 0x13c   :  { %s294_s25 = scalar_lea.hbm %s414_s2, 128 }
 0x13d   :  { %p295_p1 = scmp.ne.s32.totalorder %s414_s2, %s294_s25  ;;  %p298_p2 = scmp.lt.u32.totalorder %s294_s25, %s414_s2 }
 0x13f   :  { %p300_p3 = pnand %p298_p2, %p295_p1 }
 0x141   :  { %303 = shalt.err (!%p300_p3)
}
 0x142   :  { %169 = dma.vmem_to_hbm [thread:$0]  %s167_s22, 128, %s414_s2, [#allocation4]  }
 0x143   :  { %308 = dma.done.wait [#allocation4], 128  }
 0x144   :  { %309 = vsyncadd [#allocation4], 4294967168 }
 0x145   :  { %310 = dma.done.wait [#allocation9], 128  }
 0x146   :  { %311 = vsyncadd [#allocation9], 4294967168 }
 0x147   :  { %186 = vsyncpa [#allocation3], 1 }
 0x148   :  { %187 = vsyncpa [#allocation6], 1 }
 0x149   :  { %188 = vsyncpa [#allocation4], 1 }
 0x14a   :  { %189 = vsyncpa [#allocation9], 1 }

</bundles_post_ra>
